<compile_context>
chip_gen: v7x
topology: tpu7x:2x2x1
jax: 0.10.0
libtpu: 0.0.40
codegen_flags: <defaults>
</compile_context>

<pallas_src>
import functools

import jax
import jax.numpy as jnp
from jax.experimental import pallas as pl
from jax.experimental.pallas import tpu as pltpu


def _round_up(x, m):
    return ((x + m - 1) // m) * m


def _decoder_kernel(zc_ref, lib_ref, w1_ref, b1_ref, wf_ref, bf_ref,
                    scale_ref, r_ref, rate_ref, drop_ref, px_ref,
                    *, n_out_pad):
    # --- FCLayers: one hidden Linear + ReLU (dropout_rate=0, no norm) ---
    h = jnp.dot(zc_ref[...], w1_ref[...],
                preferred_element_type=jnp.float32) + b1_ref[...]
    h = jnp.maximum(h, 0.0)
    px_ref[...] = h

    # --- fused heads: [scale-logits | r | dropout] in one MXU pass ---
    big = jnp.dot(h.astype(wf_ref.dtype), wf_ref[...],
                  preferred_element_type=jnp.float32) + bf_ref[...]
    logits = big[:, :n_out_pad]
    r = big[:, n_out_pad:2 * n_out_pad]
    drop = big[:, 2 * n_out_pad:]

    # --- softmax over genes; padded columns carry a -1e30 bias -> exp == 0 ---
    m = jnp.max(logits, axis=-1, keepdims=True)
    e = jnp.exp(logits - m)
    denom = jnp.sum(e, axis=-1, keepdims=True)
    scale = e * pl.reciprocal(denom, approx=True)

    scale_ref[...] = scale
    r_ref[...] = r
    drop_ref[...] = drop
    # --- px_rate = exp(library) * px_scale (library broadcast over genes) ---
    rate_ref[...] = jnp.exp(lib_ref[...]) * scale


def decoder_scvi_forward(dispersion, z, library, batch_index, params, n_cat,
                         *, tile_b=128, weights_dtype=jnp.float32):
    """Pallas wrapper.

    z: (B, n_latent) f32; library: (B, 1) f32; batch_index: (B,) int32.
    params: dict of weights already transposed to (in_features, out_features)
    (PyTorch nn.Linear y = x @ W^T + b convention handled by the caller).
    `weights_dtype=jnp.bfloat16` halves weight HBM traffic (v5e/v6e knob).
    """
    z = z.astype(jnp.float32)
    library = library.astype(jnp.float32)

    # Glue: one-hot covariate injection + concat (FCLayers inject_covariates).
    onehot = jax.nn.one_hot(batch_index, n_cat, dtype=jnp.float32)
    zc = jnp.concatenate([z, onehot], axis=-1)

    B, n_in = zc.shape
    n_hidden = params["w1"].shape[1]
    n_output = params["ws"].shape[1]

    # Lane-dense padding of feature dims; batch padded to the tile grid.
    n_hid_pad = _round_up(n_hidden, 128)
    n_out_pad = _round_up(n_output, 128)
    tile_b = _round_up(max(8, min(tile_b, B)), 8)
    B_pad = _round_up(B, tile_b)

    def pad2(a, rows, cols, fill=0.0):
        return jnp.pad(a, ((0, rows - a.shape[0]), (0, cols - a.shape[1])),
                       constant_values=fill)

    w1 = pad2(params["w1"], n_in, n_hid_pad).astype(weights_dtype)
    b1 = pad2(params["b1"], 1, n_hid_pad)

    # Fused head weights [Ws | Wr | Wd] -> (n_hid_pad, 3 * n_out_pad).
    ws = pad2(params["ws"], n_hidden, n_out_pad)
    wr = pad2(params["wr"], n_hidden, n_out_pad)
    wd = pad2(params["wd"], n_hidden, n_out_pad)
    wf = jnp.pad(jnp.concatenate([ws, wr, wd], axis=1),
                 ((0, n_hid_pad - n_hidden), (0, 0))).astype(weights_dtype)
    bs = pad2(params["bs"], 1, n_out_pad, fill=-1e30)   # mask padded softmax cols
    br = pad2(params["br"], 1, n_out_pad)
    bd = pad2(params["bd"], 1, n_out_pad)
    bf = jnp.concatenate([bs, br, bd], axis=1)

    zc_p = jnp.pad(zc, ((0, B_pad - B), (0, 0)))
    lib_p = jnp.pad(library, ((0, B_pad - B), (0, 0)))

    grid = (B_pad // tile_b,)

    def row_spec(w):
        return pl.BlockSpec((tile_b, w), lambda i: (i, 0))

    def fix_spec(r, c):
        return pl.BlockSpec((r, c), lambda i: (0, 0))

    in_specs = [
        row_spec(n_in),                      # zc tile
        row_spec(1),                         # library tile
        fix_spec(n_in, n_hid_pad),           # W1 (VMEM-resident)
        fix_spec(1, n_hid_pad),              # b1
        fix_spec(n_hid_pad, 3 * n_out_pad),  # fused head weights
        fix_spec(1, 3 * n_out_pad),          # fused head biases
    ]
    out_specs = (
        row_spec(n_out_pad),   # px_scale
        row_spec(n_out_pad),   # px_r
        row_spec(n_out_pad),   # px_rate
        row_spec(n_out_pad),   # px_dropout
        row_spec(n_hid_pad),   # px (hidden)
    )
    out_shapes = (
        jax.ShapeDtypeStruct((B_pad, n_out_pad), jnp.float32),
        jax.ShapeDtypeStruct((B_pad, n_out_pad), jnp.float32),
        jax.ShapeDtypeStruct((B_pad, n_out_pad), jnp.float32),
        jax.ShapeDtypeStruct((B_pad, n_out_pad), jnp.float32),
        jax.ShapeDtypeStruct((B_pad, n_hid_pad), jnp.float32),
    )

    # VMEM budget: resident weights + double-buffered per-step I/O + temps.
    itemsize = 4
    est = itemsize * (
        2 * (n_in * n_hid_pad + n_hid_pad
             + 3 * n_hid_pad * n_out_pad + 3 * n_out_pad)
        + 2 * tile_b * (n_in + 1 + n_hid_pad + 4 * n_out_pad)
        + tile_b * (3 * n_out_pad + n_hid_pad + 2 * n_out_pad))
    vmem_limit = int(min(max(2 * est, 16 << 20), 64 << 20))  # 64 MiB cap (v7x)

    fn = pl.pallas_call(
        functools.partial(_decoder_kernel, n_out_pad=n_out_pad),
        out_shape=out_shapes,
        grid=grid,
        in_specs=in_specs,
        out_specs=out_specs,
        compiler_params=pltpu.CompilerParams(
            dimension_semantics=("parallel",),   # batch tiles independent
            vmem_limit_bytes=vmem_limit),
    )
    scale_p, r_p, rate_p, drop_p, px_p = fn(zc_p, lib_p, w1, b1, wf, bf)

    px_scale = scale_p[:B, :n_output]
    px_rate = rate_p[:B, :n_output]
    px_dropout = drop_p[:B, :n_output]
    px = px_p[:B, :n_hidden]
    # Matches the PyTorch module: px_r only for dispersion == 'gene-cell'.
    px_r = r_p[:B, :n_output] if dispersion == "gene-cell" else None
    # TODO(synk): very large gene counts (n_output >~ 30k) would additionally
    # need gene-axis tiling + two-pass softmax to stay within v7x's 64 MiB VMEM.
    return px_scale, px_r, px_rate, px_dropout, px


def _init_params(key, n_in_total, n_hidden, n_output):
    ks = jax.random.split(key, 8)
    s = 0.1
    return {
        "w1": s * jax.random.normal(ks[0], (n_in_total, n_hidden), jnp.float32),
        "b1": s * jax.random.normal(ks[1], (1, n_hidden), jnp.float32),
        "ws": s * jax.random.normal(ks[2], (n_hidden, n_output), jnp.float32),
        "bs": s * jax.random.normal(ks[3], (1, n_output), jnp.float32),
        "wr": s * jax.random.normal(ks[4], (n_hidden, n_output), jnp.float32),
        "br": s * jax.random.normal(ks[5], (1, n_output), jnp.float32),
        "wd": s * jax.random.normal(ks[6], (n_hidden, n_output), jnp.float32),
        "bd": s * jax.random.normal(ks[7], (1, n_output), jnp.float32),
    }


def _reference(dispersion, z, library, batch_index, params, n_cat):
    onehot = jax.nn.one_hot(batch_index, n_cat, dtype=jnp.float32)
    zc = jnp.concatenate([z, onehot], axis=-1)
    h = jnp.maximum(zc @ params["w1"] + params["b1"], 0.0)
    scale = jax.nn.softmax(h @ params["ws"] + params["bs"], axis=-1)
    r = (h @ params["wr"] + params["br"]) if dispersion == "gene-cell" else None
    drop = h @ params["wd"] + params["bd"]
    rate = jnp.exp(library) * scale
    return scale, r, rate, drop, h


if __name__ == "__main__":
    key = jax.random.PRNGKey(0)
    # Small but representative: n_hidden=128 (scVI default), n_output not a
    # multiple of 128 (exercises padding), B tiled into 2 grid steps.
    B, n_latent, n_cat, n_hidden, n_output = 32, 16, 3, 128, 200

    k_z, k_lib, k_bi, k_p = jax.random.split(key, 4)
    z = jax.random.normal(k_z, (B, n_latent), jnp.float32)
    library = jax.random.normal(k_lib, (B, 1), jnp.float32)
    batch_index = jax.random.randint(k_bi, (B,), 0, n_cat, jnp.int32)
    params = _init_params(k_p, n_latent + n_cat, n_hidden, n_output)

    outs = decoder_scvi_forward("gene-cell", z, library, batch_index,
                                params, n_cat, tile_b=16)
    outs = jax.block_until_ready(outs)

    refs = _reference("gene-cell", z, library, batch_index, params, n_cat)
    names = ("px_scale", "px_r", "px_rate", "px_dropout", "px")
    for name, o, r in zip(names, outs, refs):
        assert o.shape == r.shape and o.dtype == r.dtype, name
        assert jnp.allclose(o, r, atol=1e-3, rtol=1e-3), name

    print("KERNEL_OK")
</pallas_src>

<mosaic_0001>
module attributes {stable_mosaic.version = 11 : i64} {
  func.func @_decoder_kernel(%arg0: i32, %arg1: memref<16x19xf32, #tpu.memory_space<vmem>>, %arg2: memref<16x1xf32, #tpu.memory_space<vmem>>, %arg3: memref<19x128xf32, #tpu.memory_space<vmem>>, %arg4: memref<1x128xf32, #tpu.memory_space<vmem>>, %arg5: memref<128x768xf32, #tpu.memory_space<vmem>>, %arg6: memref<1x768xf32, #tpu.memory_space<vmem>>, %arg7: memref<16x256xf32, #tpu.memory_space<vmem>>, %arg8: memref<16x256xf32, #tpu.memory_space<vmem>>, %arg9: memref<16x256xf32, #tpu.memory_space<vmem>>, %arg10: memref<16x256xf32, #tpu.memory_space<vmem>>, %arg11: memref<16x128xf32, #tpu.memory_space<vmem>>) attributes {dimension_semantics = [#tpu.dimension_semantics<parallel>], iteration_bounds = array<i64: 2>, scalar_prefetch = 0 : i64, scratch_operands = 0 : i64, tpu.core_type = #tpu.core_type<tc>, window_params = [{transform_indices = @transform_0, window_bounds = array<i64: 16, 19>}, {transform_indices = @transform_1, window_bounds = array<i64: 16, 1>}, {pipeline_mode = #tpu.pipeline_mode<synchronous>, transform_indices = @transform_2, window_bounds = array<i64: 19, 128>}, {pipeline_mode = #tpu.pipeline_mode<synchronous>, transform_indices = @transform_3, window_bounds = array<i64: 1, 128>}, {pipeline_mode = #tpu.pipeline_mode<synchronous>, transform_indices = @transform_4, window_bounds = array<i64: 128, 768>}, {pipeline_mode = #tpu.pipeline_mode<synchronous>, transform_indices = @transform_5, window_bounds = array<i64: 1, 768>}, {transform_indices = @transform_6, window_bounds = array<i64: 16, 256>}, {transform_indices = @transform_7, window_bounds = array<i64: 16, 256>}, {transform_indices = @transform_8, window_bounds = array<i64: 16, 256>}, {transform_indices = @transform_9, window_bounds = array<i64: 16, 256>}, {transform_indices = @transform_10, window_bounds = array<i64: 16, 128>}]} {
    %c0 = arith.constant 0 : index
    %c0_0 = arith.constant 0 : index
    %0 = vector.load %arg1[%c0, %c0_0] : memref<16x19xf32, #tpu.memory_space<vmem>>, vector<16x19xf32>
    %c0_1 = arith.constant 0 : index
    %c0_2 = arith.constant 0 : index
    %1 = vector.load %arg3[%c0_1, %c0_2] : memref<19x128xf32, #tpu.memory_space<vmem>>, vector<19x128xf32>
    %cst = arith.constant dense<0.000000e+00> : vector<16x128xf32>
    %2 = tpu.matmul %0, %1, %cst {dimension_numbers = #tpu.dot_dimension_numbers<[1], [0], [0], [1], [0, 0, 1, 1], [], []>} : vector<16x19xf32>, vector<19x128xf32>, vector<16x128xf32> -> vector<16x128xf32>
    %c0_3 = arith.constant 0 : index
    %c0_4 = arith.constant 0 : index
    %3 = vector.load %arg4[%c0_3, %c0_4] : memref<1x128xf32, #tpu.memory_space<vmem>>, vector<1x128xf32>
    %4 = vector.broadcast %3 : vector<1x128xf32> to vector<16x128xf32>
    %5 = arith.addf %2, %4 : vector<16x128xf32>
    %cst_5 = arith.constant 0.000000e+00 : f32
    %6 = vector.broadcast %cst_5 : f32 to vector<16x128xf32>
    %7 = arith.maximumf %5, %6 : vector<16x128xf32>
    %c0_6 = arith.constant 0 : index
    %c0_7 = arith.constant 0 : index
    %8 = vector.load %arg11[%c0_6, %c0_7] : memref<16x128xf32, #tpu.memory_space<vmem>>, vector<16x128xf32>
    tpu.vector_store %arg11[%c0_6, %c0_7], %7 {strides = array<i32>} : memref<16x128xf32, #tpu.memory_space<vmem>>, vector<16x128xf32>,
    %c0_8 = arith.constant 0 : index
    %c0_9 = arith.constant 0 : index
    %9 = vector.load %arg5[%c0_8, %c0_9] : memref<128x768xf32, #tpu.memory_space<vmem>>, vector<128x768xf32>
    %cst_10 = arith.constant dense<0.000000e+00> : vector<16x768xf32>
    %10 = tpu.matmul %7, %9, %cst_10 {dimension_numbers = #tpu.dot_dimension_numbers<[1], [0], [0], [1], [0, 0, 1, 1], [], []>} : vector<16x128xf32>, vector<128x768xf32>, vector<16x768xf32> -> vector<16x768xf32>
    %c0_11 = arith.constant 0 : index
    %c0_12 = arith.constant 0 : index
    %11 = vector.load %arg6[%c0_11, %c0_12] : memref<1x768xf32, #tpu.memory_space<vmem>>, vector<1x768xf32>
    %12 = vector.broadcast %11 : vector<1x768xf32> to vector<16x768xf32>
    %13 = arith.addf %10, %12 : vector<16x768xf32>
    %14 = vector.extract_strided_slice %13 {offsets = [0, 0], sizes = [16, 256], strides = [1, 1]} : vector<16x768xf32> to vector<16x256xf32>
    %15 = vector.extract_strided_slice %13 {offsets = [0, 256], sizes = [16, 256], strides = [1, 1]} : vector<16x768xf32> to vector<16x256xf32>
    %16 = vector.extract_strided_slice %13 {offsets = [0, 512], sizes = [16, 256], strides = [1, 1]} : vector<16x768xf32> to vector<16x256xf32>
    %cst_13 = arith.constant dense<0xFF800000> : vector<16xf32>
    %17 = vector.multi_reduction <maximumf>, %14, %cst_13 [1] : vector<16x256xf32> to vector<16xf32>
    %18 = vector.shape_cast %17 : vector<16xf32> to vector<16x1xf32>
    %19 = vector.broadcast %18 : vector<16x1xf32> to vector<16x256xf32>
    %20 = arith.subf %14, %19 : vector<16x256xf32>
    %21 = math.exp %20 : vector<16x256xf32>
    %cst_14 = arith.constant dense<0.000000e+00> : vector<16xf32>
    %22 = vector.multi_reduction <add>, %21, %cst_14 [1] : vector<16x256xf32> to vector<16xf32>
    %23 = vector.shape_cast %22 : vector<16xf32> to vector<16x1xf32>
    %24 = tpu.reciprocal %23 {approx = true} : vector<16x1xf32> -> vector<16x1xf32>
    %25 = vector.broadcast %24 : vector<16x1xf32> to vector<16x256xf32>
    %26 = arith.mulf %21, %25 : vector<16x256xf32>
    %c0_15 = arith.constant 0 : index
    %c0_16 = arith.constant 0 : index
    %27 = vector.load %arg7[%c0_15, %c0_16] : memref<16x256xf32, #tpu.memory_space<vmem>>, vector<16x256xf32>
    tpu.vector_store %arg7[%c0_15, %c0_16], %26 {strides = array<i32>} : memref<16x256xf32, #tpu.memory_space<vmem>>, vector<16x256xf32>,
    %c0_17 = arith.constant 0 : index
    %c0_18 = arith.constant 0 : index
    %28 = vector.load %arg8[%c0_17, %c0_18] : memref<16x256xf32, #tpu.memory_space<vmem>>, vector<16x256xf32>
    tpu.vector_store %arg8[%c0_17, %c0_18], %15 {strides = array<i32>} : memref<16x256xf32, #tpu.memory_space<vmem>>, vector<16x256xf32>,
    %c0_19 = arith.constant 0 : index
    %c0_20 = arith.constant 0 : index
    %29 = vector.load %arg10[%c0_19, %c0_20] : memref<16x256xf32, #tpu.memory_space<vmem>>, vector<16x256xf32>
    tpu.vector_store %arg10[%c0_19, %c0_20], %16 {strides = array<i32>} : memref<16x256xf32, #tpu.memory_space<vmem>>, vector<16x256xf32>,
    %c0_21 = arith.constant 0 : index
    %c0_22 = arith.constant 0 : index
    %30 = vector.load %arg2[%c0_21, %c0_22] : memref<16x1xf32, #tpu.memory_space<vmem>>, vector<16x1xf32>
    %31 = math.exp %30 : vector<16x1xf32>
    %32 = vector.broadcast %31 : vector<16x1xf32> to vector<16x256xf32>
    %33 = arith.mulf %32, %26 : vector<16x256xf32>
    %c0_23 = arith.constant 0 : index
    %c0_24 = arith.constant 0 : index
    %34 = vector.load %arg9[%c0_23, %c0_24] : memref<16x256xf32, #tpu.memory_space<vmem>>, vector<16x256xf32>
    tpu.vector_store %arg9[%c0_23, %c0_24], %33 {strides = array<i32>} : memref<16x256xf32, #tpu.memory_space<vmem>>, vector<16x256xf32>,
    return
  }
  func.func @transform_0(%arg0: i32) -> (i32, i32) {
    %c0_i32 = arith.constant 0 : i32
    %c0_i32_0 = arith.constant 0 : i32
    return %arg0, %c0_i32 : i32, i32
  }
  func.func @transform_1(%arg0: i32) -> (i32, i32) {
    %c0_i32 = arith.constant 0 : i32
    %c0_i32_0 = arith.constant 0 : i32
    return %arg0, %c0_i32 : i32, i32
  }
  func.func @transform_2(%arg0: i32) -> (i32, i32) {
    %c0_i32 = arith.constant 0 : i32
    %c0_i32_0 = arith.constant 0 : i32
    %c0_i32_1 = arith.constant 0 : i32
    return %c0_i32, %c0_i32_0 : i32, i32
  }
  func.func @transform_3(%arg0: i32) -> (i32, i32) {
    %c0_i32 = arith.constant 0 : i32
    %c0_i32_0 = arith.constant 0 : i32
    %c0_i32_1 = arith.constant 0 : i32
    return %c0_i32, %c0_i32_0 : i32, i32
  }
  func.func @transform_4(%arg0: i32) -> (i32, i32) {
    %c0_i32 = arith.constant 0 : i32
    %c0_i32_0 = arith.constant 0 : i32
    %c0_i32_1 = arith.constant 0 : i32
    return %c0_i32, %c0_i32_0 : i32, i32
  }
  func.func @transform_5(%arg0: i32) -> (i32, i32) {
    %c0_i32 = arith.constant 0 : i32
    %c0_i32_0 = arith.constant 0 : i32
    %c0_i32_1 = arith.constant 0 : i32
    return %c0_i32, %c0_i32_0 : i32, i32
  }
  func.func @transform_6(%arg0: i32) -> (i32, i32) {
    %c0_i32 = arith.constant 0 : i32
    %c0_i32_0 = arith.constant 0 : i32
    return %arg0, %c0_i32 : i32, i32
  }
  func.func @transform_7(%arg0: i32) -> (i32, i32) {
    %c0_i32 = arith.constant 0 : i32
    %c0_i32_0 = arith.constant 0 : i32
    return %arg0, %c0_i32 : i32, i32
  }
  func.func @transform_8(%arg0: i32) -> (i32, i32) {
    %c0_i32 = arith.constant 0 : i32
    %c0_i32_0 = arith.constant 0 : i32
    return %arg0, %c0_i32 : i32, i32
  }
  func.func @transform_9(%arg0: i32) -> (i32, i32) {
    %c0_i32 = arith.constant 0 : i32
    %c0_i32_0 = arith.constant 0 : i32
    return %arg0, %c0_i32 : i32, i32
  }
  func.func @transform_10(%arg0: i32) -> (i32, i32) {
    %c0_i32 = arith.constant 0 : i32
    %c0_i32_0 = arith.constant 0 : i32
    return %arg0, %c0_i32 : i32, i32
  }
}

</mosaic_0001>

<bundles_post_ra>
// kernel: tpu_custom_call.1
= control target key start
LH: loop header
LB: loop body
LE: loop exit
PB: predicated region body
PF: predicated region fallthrough
CT: control target
= control target key end

     0   :  { %s2208_s0 = inlined_call_operand.vmem [shape: f32[32,19], index: 0, kind: input, shape index: {}]   ;;  %s2209_s1 = inlined_call_operand.vmem [shape: f32[32,1], index: 1, kind: input, shape index: {}]   ;;  %s2210_s2 = inlined_call_operand.vmem [shape: f32[19,128], index: 2, kind: input, shape index: {}]   ;;  %s2211_s3 = inlined_call_operand.vmem [shape: f32[1,128], index: 3, kind: input, shape index: {}]   ;;  %s2212_s4 = inlined_call_operand.hbm [shape: f32[128,768], index: 4, kind: input, shape index: {}]   ;;  %s2213_s5 = inlined_call_operand.vmem [shape: f32[1,768], index: 5, kind: input, shape index: {}]   ;;  %s2214_s6 = inlined_call_operand.hbm [shape: f32[32,256], index: 6, kind: output, shape index: {0}]   ;;  %s2215_s7 = inlined_call_operand.hbm [shape: f32[32,256], index: 7, kind: output, shape index: {1}]   ;;  %s2216_s8 = inlined_call_operand.hbm [shape: f32[32,256], index: 8, kind: output, shape index: {2}]   ;;  %s2217_s9 = inlined_call_operand.hbm [shape: f32[32,256], index: 9, kind: output, shape index: {3}]   ;;  %s2218_s10 = inlined_call_operand.hbm [shape: f32[32,128], index: 10, kind: output, shape index: {4}]  }
   0x1   :  { %2224 = sst [smem:[#allocation17_spill]] %s2208_s0 }
   0x2   :  { %2225 = sst [smem:[#allocation18_spill]] %s2209_s1 }
   0x3   :  { %2226 = sst [smem:[#allocation19_spill]] %s2210_s2 }
   0x4   :  { %2227 = sst [smem:[#allocation20_spill]] %s2211_s3 }
   0x5   :  { %2228 = sst [smem:[#allocation21_spill]] %s2212_s4 }
   0x6   :  { %2229 = sst [smem:[#allocation22_spill]] %s2213_s5 }
   0x7   :  { %2230 = sst [smem:[#allocation23_spill]] %s2215_s7 }
   0x8   :  { %16 = vsyncpa [#allocation3], 0 }
   0x9   :  { %17 = vsyncpa [#allocation4], 0 }
   0xa   :  { %19 = vsyncpa [#allocation4 + $0x1], 0 }
   0xb   :  { %20 = vsyncpa [#allocation7], 0 }
   0xc   :  { %22 = vsyncpa [#allocation7 + $0x1], 0 }
   0xd   :  { %23 = vsyncpa [#allocation10], 0 }
   0xe   :  { %25 = vsyncpa [#allocation10 + $0x1], 0  ;;  %s1818_s13 = smov 0   ;;  %s1820_s14 = smov 0  }
   0xf   :  { %s1822_s15 = smov 0   ;;  %s1824_s16 = smov 0  }
  0x10 LB: > { %s1839_s17 = sadd.s32 4294967295, %s1747_s16   ;;  %s2219_s18 = sadd.s32 4294967294, %s1747_s16   ;;  %s1747_s16 = sphi %s1824_s16, %s2255_s16   ;;  %s1743_s15 = sphi %s1822_s15, %s2254_s15   ;;  %s1739_s14 = sphi %s1820_s14, %s2253_s14   ;;  %s1735_s13 = sphi %s1818_s13, %s2252_s13  }
  0x11   : > { %s1843_s19 = sadd.s32 1, %s1747_s16   ;;  %s174_s20 = sadd.s32 1, %s1743_s15 }
  0x12   : > { %s171_s21 = ssub.s32 %s1747_s16, %s1843_s19  ;;  %p184_p0 = scmp.ne.s32.totalorder %s1743_s15, %s1739_s14 }
  0x13   : > { %p172_p1 = scmp.eq.s32.totalorder %s171_s21, 0  ;;  %p185_p2 = scmp.eq.s32.totalorder %s1839_s17, 1 }
  0x14   : > { %p190_p3 = scmp.ne.s32.totalorder %s1739_s14, %s1735_s13  ;;  %p191_p4 = scmp.eq.s32.totalorder %s2219_s18, 1 }
  0x15   : > { %s1856_s22 = scalar_select %p172_p1, %s1743_s15, %s174_s20  }
  0x16   : > { %p1858_p5 = por %p185_p2, %p184_p0  ;;  %p1862_p6 = por %p191_p4, %p190_p3 }
  0x17   : > { %2231 = sst [smem:[#allocation16_spill]] %s1856_s22  ;;  %p1275_p7 = scmp.ge.s32.totalorder %s1747_s16, 1 }
  0x18   : > { %s2232_s23 = scalar_select %p1858_p5, 1, 0 }
  0x19   : > { %s2233_s24 = scalar_select %p1862_p6, 1, 0 }
  0x1a   : > { %p302_p8 = scmp.lt.s32.totalorder %s1747_s16, 3  ;;  %p2220_p9 = scmp.eq.s32.totalorder %s1839_s17, 0 }
  0x1b   : > { %s1749_s26 = smov [#allocation2]   ;;  %s2236_s4 = sld [smem:[#allocation21_spill]] }
  0x1c   : > { %p1869_p10 = pnand %p1275_p7, %p302_p8  ;;  %s320_s27 = sshll.u32 %s1749_s26, 4  ;;  %s321_s27 = int_to_ptr.vmem [resolvable:$true] %s320_s27 }
  0x1e   : > { %s2234_s25 = scalar_select %p1869_p10, 1, 0 }
  0x1f   : > { %p1451_p11 = pneg %p1869_p10 }
  0x21   : > { %p1877_p12 = pnand %p2220_p9, %p1451_p11  ;;  %s1533_s11 = scalar_lea.hbm %s2236_s4, 12288 }
  0x22   : > { %p1534_p13 = scmp.ne.s32.totalorder %s2236_s4, %s1533_s11  ;;  %p1540_p3 = scmp.lt.u32.totalorder %s1533_s11, %s2236_s4 }
  0x23   : > { %p1535_p0 = pneg %p1877_p12 }
  0x25   : > { %p1536_p1 = pnand %p1535_p0, %p1534_p13 }
  0x27   : > { %p1537_p2 = pneg %p1536_p1 }
  0x29   : > { %p1542_p4 = pnand %p1540_p3, %p1537_p2 }
  0x2b   : > { %1545 = shalt.err (!%p1542_p4)
}
  0x2c   : > { %s1546_s18 = scalar_lea.vmem %s321_s27, 12288  ;;  %p1554_p9 = scmp.lt.s32.totalorder %s321_s27, %s321_s27 }
  0x2d   : > { %p1547_p7 = scmp.ne.s32.totalorder %s321_s27, %s1546_s18  ;;  %p1555_p6 = scmp.lt.s32.totalorder %s1546_s18, %s1546_s18 }
  0x2f   : > { %p1549_p8 = pnand %p1547_p7, %p1535_p0  ;;  %p1556_p5 = por %p1555_p6, %p1554_p9 }
  0x31   : > { %p1550_p11 = pneg %p1549_p8 }
  0x33   : > { %p1557_p10 = pnand %p1556_p5, %p1550_p11 }
  0x35   : > { %1560 = shalt.err (!%p1557_p10)
}
  0x36   : > { %s1750_s29 = smov 768   ;;  %s1751_s30 = smov 48  }
  0x37   : > { %1454 = dma.hbm_to_vmem [thread:$0]  (!%p1877_p12), %s2236_s4, 12288, %s321_s27, [#allocation3], %s1750_s29, %s1750_s29, %s1751_s30  }
  0x38   : > { %p2237_p13 = scmp.ne.s32.totalorder %s2234_s25, 0 }
  0x39   : > { %p2238_p1 = scmp.eq.s32.totalorder (!%p2237_p13), %s1839_s17, 0 }
  0x3a   : > { %357 = sbr.rel (%p2237_p13) target bundleno = 871 (0x367), region = 44 }
  0x41   : > { %1718 = dma.done.wait (%p2238_p1), [#allocation3], 12288   ;;  %p2239_p0 = pmov %p2238_p1 }
  0x42   : > { %s1285_s18 = sshll.u32 %s1839_s17, 1  ;;  %s2240_s0 = sld [smem:[#allocation17_spill]]  ;;  %vm449_vm0 = vcmask 154624   ;;  %vm456_vm1 = vcmask 1042432   ;;  %v540_v5 = vld [vmem:[#allocation2 + $0x8] sm:$0xff]  ;;  %v546_v6 = vld [vmem:[#allocation2 + $0x38] sm:$0xff] }
  0x43   : > { %1720 = vsyncadd (%p2239_p0), [#allocation3], 4294955008  ;;  %p421_p5 = scmp.lt.s32.totalorder %s1285_s18, 3  ;;  %s2241_s2 = sld [smem:[#allocation19_spill]]  ;;  %v1341_v7 = vpack.c.bf16 %v546_v6, %v540_v5  ;;  %v539_v8 = vld [vmem:[#allocation2] sm:$0xff]  ;;  %v545_v9 = vld [vmem:[#allocation2 + $0x30] sm:$0xff] }
  0x44   : > { %v542_v10 = vld [vmem:[#allocation2 + $0x18] sm:$0xff]  ;;  %v1343_v12 = vpack.c.bf16 %v545_v9, %v539_v8  ;;  %v548_v13 = vld [vmem:[#allocation2 + $0x48] sm:$0xff]  ;;  %v541_v14 = vld [vmem:[#allocation2 + $0x10] sm:$0xff]  ;;  %s1928_s11 = sand.u32 1, %s1739_s14   ;;  %s2242_s3 = sld [smem:[#allocation20_spill]] }
  0x45   : > { %s2257_s18 = smov (!%p421_p5, %s1285_s18), 3  ;;  %v547_v15 = vld [vmem:[#allocation2 + $0x40] sm:$0xff]  ;;  %1342 = vmatprep.subr.bf16.mxu1 %v1341_v7  ;;  %v1373_v16 = vpack.c.bf16 %v548_v13, %v542_v10  ;;  %v552_v17 = vld [vmem:[#allocation2 + $0x68] sm:$0xff]  ;;  %v558_v18 = vld [vmem:[#allocation2 + $0x98] sm:$0xff]  ;;  %s1284_s21 = sshll.u32 %s1928_s11, 4 }
  0x46   : > { %s1286_s28 = sshll.u32 %s2257_s18, 3  ;;  %v551_v19 = vld [vmem:[#allocation2 + $0x60] sm:$0xff]  ;;  %1344 = vmatpush1.bf16.msra.mxu1 %v1343_v12  ;;  %v1375_v20 = vpack.c.bf16 %v547_v15, %v541_v14  ;;  %v1345_v21 = vpack.c.bf16 %v558_v18, %v552_v17  ;;  %v557_v22 = vld [vmem:[#allocation2 + $0x90] sm:$0xff]  ;;  %v554_v23 = vld [vmem:[#allocation2 + $0x78] sm:$0xff]  ;;  %s1938_s26 = scalar_lea.vmem [#allocation11], %s1284_s21 }
  0x47   : > { %v560_v24 = vld [vmem:[#allocation2 + $0xa8] sm:$0xff]  ;;  %v1347_v25 = vpack.c.bf16 %v557_v22, %v551_v19  ;;  %v553_v27 = vld [vmem:[#allocation2 + $0x70] sm:$0xff]  ;;  %v559_v28 = vld [vmem:[#allocation2 + $0xa0] sm:$0xff]  ;;  %s2243_s5 = sld [smem:[#allocation22_spill]]  ;;  %s1958_s12 = sshll.u32 %s1928_s11, 5 }
  0x48   : > { %s424_s25 = scalar_lea.vmem %s2240_s0, %s1286_s28  ;;  %v1377_v26 = vpack.c.bf16 %v560_v24, %v554_v23  ;;  %v564_v29 = vld [vmem:[#allocation2 + $0xc8] sm:$0xff]  ;;  %1346 = vmatprep.subr.bf16.mxu1 %v1345_v21  ;;  %v570_v30 = vld [vmem:[#allocation2 + $0xf8] sm:$0xff]  ;;  %v563_v31 = vld [vmem:[#allocation2 + $0xc0] sm:$0xff]  ;;  %v1379_v36 = vpack.c.bf16 %v559_v28, %v553_v27  ;;  %s1961_s20 = scalar_lea.vmem [#allocation6], %s1958_s12 }
  0x49   : > { %v439_v0 = vld [vmem:[%s2241_s2] sm:$0xff]  ;;  %v440_v1 = vld [vmem:[%s2241_s2 + $0x8] sm:$0xff]  ;;  %v441_v4 = vld [vmem:[%s2241_s2 + $0x10] sm:$0x7]  ;;  %v1349_v33 = vpack.c.bf16 %v570_v30, %v564_v29  ;;  %s2244_s1 = sld [smem:[#allocation18_spill]]  ;;  %s1976_s29 = scalar_lea.vmem [#allocation9], %s1958_s12 }
  0x4a   : > { %v1337_v2 = vpack.c.bf16 %v440_v1, %v439_v0  ;;  %v437_v3 = vld [vmem:[%s424_s25] sm:$0xff]  ;;  %v438_v11 = vld [vmem:[%s424_s25 + $0x8] sm:$0xff]  ;;  %v569_v32 = vld [vmem:[#allocation2 + $0xf0] sm:$0xff]  ;;  %1348 = vmatpush1.bf16.msra.mxu1 %v1347_v25  ;;  %s1016_s18 = sshll.u32 %s1961_s20, 4  ;;  %s2223_s27 = sand.u32 1, %s1839_s17   ;;  %s1998_s18 = int_to_ptr.vmem [resolvable:$true] %s1016_s18 }
  0x4b   : > { %1334 = vmatprep.mubr.msk.f32.mxu0 %vm449_vm0, %v437_v3  ;;  %v566_v34 = vld [vmem:[#allocation2 + $0xd8] sm:$0xff]  ;;  %v572_v35 = vld [vmem:[#allocation2 + $0x108] sm:$0xff]  ;;  %v1351_v37 = vpack.c.bf16 %v569_v32, %v563_v31  ;;  %v565_v38 = vld [vmem:[#allocation2 + $0xd0] sm:$0xff]  ;;  %1350 = vmatprep.subr.bf16.mxu1 %v1349_v33  ;;  %s2004_s25 = sshll.u32 %s1839_s17, 9  ;;  %s2245_s7 = sld [smem:[#allocation23_spill]] }
  0x4c   : > { %1338 = vmatprep.subr.bf16.mxu0 %v1337_v2  ;;  %v576_v39 = vld [vmem:[#allocation2 + $0x128] sm:$0xff]  ;;  %v582_v40 = vld [vmem:[#allocation2 + $0x158] sm:$0xff]  ;;  %v1381_v41 = vpack.c.bf16 %v572_v35, %v566_v34  ;;  %v571_v42 = vld [vmem:[#allocation2 + $0x100] sm:$0xff]  ;;  %p2246_p9 = scmp.ne.s32.totalorder %s2232_s23, 0  ;;  %s1754_s30 = smov [#allocation6]  }
  0x4d   : > { %1340 = vmatpush3.bf16.msra.mxu0 %v1337_v2  ;;  %v1353_v43 = vpack.c.bf16 %v582_v40, %v576_v39  ;;  %v575_v44 = vld [vmem:[#allocation2 + $0x120] sm:$0xff]  ;;  %v581_v45 = vld [vmem:[#allocation2 + $0x150] sm:$0xff]  ;;  %v578_v46 = vld [vmem:[#allocation2 + $0x138] sm:$0xff]  ;;  %v1383_v50 = vpack.c.bf16 %v571_v42, %v565_v38  ;;  %s1565_s2 = sshll.u32 %s1754_s30, 4  ;;  %s1566_s2 = int_to_ptr.vmem [resolvable:$false] %s1565_s2 }
  0x4e   : > { %1332 = vmatprep.subr.msk.mxu0 %vm456_vm1, %v441_v4  ;;  %v584_v47 = vld [vmem:[#allocation2 + $0x168] sm:$0xff]  ;;  %v594_v49 = vld [vmem:[#allocation2 + $0x1b8] sm:$0xff]  ;;  %1352 = vmatpush1.bf16.msra.mxu1 %v1351_v37  ;;  %v1355_v51 = vpack.c.bf16 %v581_v45, %v575_v44  ;;  %v577_v52 = vld [vmem:[#allocation2 + $0x130] sm:$0xff]  ;;  %p1568_p2 = scmp.lt.s32.totalorder %s1998_s18, %s1566_s2 }
  0x4f   : > { %v588_v48 = vld [vmem:[#allocation2 + $0x188] sm:$0xff]  ;;  %v583_v53 = vld [vmem:[#allocation2 + $0x160] sm:$0xff]  ;;  %1354 = vmatprep.subr.bf16.mxu1 %v1353_v43  ;;  %v1385_v54 = vpack.c.bf16 %v584_v47, %v578_v46  ;;  %v593_v57 = vld [vmem:[#allocation2 + $0x1b0] sm:$0xff]  ;;  %s1972_s21 = scalar_lea.vmem %s2244_s1, %s1286_s28  ;;  %s1050_s28 = sshll.u32 %s1976_s29, 4  ;;  %s2000_s28 = int_to_ptr.vmem [resolvable:$true] %s1050_s28 }
  0x50   : > { %v1357_v55 = vpack.c.bf16 %v594_v49, %v588_v48  ;;  %v587_v56 = vld [vmem:[#allocation2 + $0x180] sm:$0xff]  ;;  %v590_v58 = vld [vmem:[#allocation2 + $0x198] sm:$0xff]  ;;  %v596_v59 = vld [vmem:[#allocation2 + $0x1c8] sm:$0xff]  ;;  %v1387_v62 = vpack.c.bf16 %v583_v53, %v577_v52 }
  0x51   : > { %1333 = vmatpush3.msk.msra.mxu0 %vm456_vm1, %v441_v4  ;;  %v600_v60 = vld [vmem:[#allocation2 + $0x1e8] sm:$0xff]  ;;  %v606_v61 = vld [vmem:[#allocation2 + $0x218] sm:$0xff]  ;;  %v1359_v63 = vpack.c.bf16 %v593_v57, %v587_v56  ;;  %v589_v0 = vld [vmem:[#allocation2 + $0x190] sm:$0xff]  ;;  %v1389_v2 = vpack.c.bf16 %v596_v59, %v590_v58  ;;  %s2010_s1 = scalar_lea.hbm %s2245_s7, %s2004_s25 }
  0x52   : > { %1335 = vmatmul.mubr.msk.f32.vlgmr.msra.gmra.mrb[0].mxu0 %vm449_vm0, %v438_v11  ;;  %1374 = vmatprep.subr.bf16.mxu0 %v1373_v16  ;;  %v595_v1 = vld [vmem:[#allocation2 + $0x1c0] sm:$0xff]  ;;  %v1361_v3 = vpack.c.bf16 %v606_v61, %v600_v60  ;;  %v605_v5 = vld [vmem:[#allocation2 + $0x210] sm:$0xff]  ;;  %v602_v6 = vld [vmem:[#allocation2 + $0x1f8] sm:$0xff] }
  0x53   : > { %1376 = vmatpush1.bf16.msra.mxu0 %v1375_v20  ;;  %1356 = vmatpush1.bf16.msra.mxu1 %v1355_v51  ;;  %v599_v4 = vld [vmem:[#allocation2 + $0x1e0] sm:$0xff]  ;;  %v608_v7 = vld [vmem:[#allocation2 + $0x228] sm:$0xff]  ;;  %v618_v9 = vld [vmem:[#allocation2 + $0x278] sm:$0xff]  ;;  %v1391_v10 = vpack.c.bf16 %v595_v1, %v589_v0 }
  0x54   : > { %1378 = vmatprep.subr.bf16.mxu0 %v1377_v26  ;;  %1358 = vmatprep.subr.bf16.mxu1 %v1357_v55  ;;  %v612_v8 = vld [vmem:[#allocation2 + $0x248] sm:$0xff]  ;;  %v1363_v11 = vpack.c.bf16 %v605_v5, %v599_v4  ;;  %v601_v12 = vld [vmem:[#allocation2 + $0x1f0] sm:$0xff]  ;;  %v1393_v13 = vpack.c.bf16 %v608_v7, %v602_v6  ;;  %v607_v14 = vld [vmem:[#allocation2 + $0x220] sm:$0xff] }
  0x55   : > { %v1365_v15 = vpack.c.bf16 %v618_v9, %v612_v8  ;;  %v611_v16 = vld [vmem:[#allocation2 + $0x240] sm:$0xff]  ;;  %v617_v17 = vld [vmem:[#allocation2 + $0x270] sm:$0xff]  ;;  %v614_v18 = vld [vmem:[#allocation2 + $0x258] sm:$0xff]  ;;  %v1395_v20 = vpack.c.bf16 %v607_v14, %v601_v12 }
  0x56   : > { %v620_v19 = vld [vmem:[#allocation2 + $0x288] sm:$0xff]  ;;  %v1367_v21 = vpack.c.bf16 %v617_v17, %v611_v16  ;;  %v613_v23 = vld [vmem:[#allocation2 + $0x250] sm:$0xff]  ;;  %v619_v24 = vld [vmem:[#allocation2 + $0x280] sm:$0xff] }
  0x57   : > { %1380 = vmatpush1.bf16.msra.mxu0 %v1379_v36  ;;  %1360 = vmatpush1.bf16.msra.mxu1 %v1359_v63  ;;  %v1397_v22 = vpack.c.bf16 %v620_v19, %v614_v18  ;;  %v1399_v25 = vpack.c.bf16 %v619_v24, %v613_v23  ;;  %v624_v26 = vld [vmem:[#allocation2 + $0x2a8] sm:$0xff]  ;;  %v630_v27 = vld [vmem:[#allocation2 + $0x2d8] sm:$0xff]  ;;  %v623_v29 = vld [vmem:[#allocation2 + $0x2a0] sm:$0xff] }
  0x58   : > { %1382 = vmatprep.subr.bf16.mxu0 %v1381_v41  ;;  %1362 = vmatprep.subr.bf16.mxu1 %v1361_v3  ;;  %v1369_v28 = vpack.c.bf16 %v630_v27, %v624_v26  ;;  %v629_v30 = vld [vmem:[#allocation2 + $0x2d0] sm:$0xff]  ;;  %v626_v31 = vld [vmem:[#allocation2 + $0x2b8] sm:$0xff]  ;;  %v632_v33 = vld [vmem:[#allocation2 + $0x2e8] sm:$0xff]  ;;  %v1752_v41 = vmov 0.0  }
  0x59   : > { %v1371_v32 = vpack.c.bf16 %v629_v30, %v623_v29  ;;  %v625_v34 = vld [vmem:[#allocation2 + $0x2b0] sm:$0xff]  ;;  %v1401_v35 = vpack.c.bf16 %v632_v33, %v626_v31  ;;  %v631_v36 = vld [vmem:[#allocation2 + $0x2e0] sm:$0xff]  ;;  %v544_v38 = vld [vmem:[#allocation2 + $0x28] sm:$0xff]  ;;  %731 = vmatprep.mubr.f32.mxu1 %v1752_v41  ;;  %808 = vmatprep.mubr.f32.mxu0 %v1752_v41  ;;  %v637_v30 = vlaneseq }
  0x5a   : > { %v1403_v37 = vpack.c.bf16 %v631_v36, %v625_v34  ;;  %v550_v39 = vld [vmem:[#allocation2 + $0x58] sm:$0xff]  ;;  %v1289_v42 = vld [vmem:[%s2242_s3] ss:$0 sm:$0xff]  ;;  %v549_v45 = vld [vmem:[#allocation2 + $0x50] sm:$0xff]  ;;  %s1567_s3 = scalar_lea.vmem %s1566_s2, 1024 }
  0x5b   : > { %1384 = vmatpush1.bf16.msra.mxu0 %v1383_v50  ;;  %1364 = vmatpush1.bf16.msra.mxu1 %v1363_v11  ;;  %v1405_v40 = vpack.c.bf16 %v550_v39, %v544_v38  ;;  %v543_v44 = vld [vmem:[#allocation2 + $0x20] sm:$0xff]  ;;  %v556_v48 = vld [vmem:[#allocation2 + $0x88] sm:$0xff]  ;;  %v562_v49 = vld [vmem:[#allocation2 + $0xb8] sm:$0xff]  ;;  %v638_v31 = vshrl.u32 %v637_v30, 7 }
  0x5c   : > { %1386 = vmatprep.subr.bf16.mxu0 %v1385_v54  ;;  %1366 = vmatprep.subr.bf16.mxu1 %v1365_v15  ;;  %v1407_v52 = vpack.c.bf16 %v549_v45, %v543_v44  ;;  %v1409_v54 = vpack.c.bf16 %v562_v49, %v556_v48  ;;  %v555_v55 = vld [vmem:[#allocation2 + $0x80] sm:$0xff]  ;;  %v561_v56 = vld [vmem:[#allocation2 + $0xb0] sm:$0xff]  ;;  %v568_v57 = vld [vmem:[#allocation2 + $0xe8] sm:$0xff] }
  0x5d   : > { %v574_v58 = vld [vmem:[#allocation2 + $0x118] sm:$0xff]  ;;  %v1411_v59 = vpack.c.bf16 %v561_v56, %v555_v55  ;;  %v567_v61 = vld [vmem:[#allocation2 + $0xe0] sm:$0xff]  ;;  %v580_v63 = vld [vmem:[#allocation2 + $0x148] sm:$0xff]  ;;  %v647_v33 = vsub.s32 2, %v638_v31  ;;  %v651_v36 = vsub.s32 3, %v638_v31 }
  0x5e   : > { %v1413_v60 = vpack.c.bf16 %v574_v58, %v568_v57  ;;  %v586_v0 = vld [vmem:[#allocation2 + $0x178] sm:$0xff]  ;;  %v579_v3 = vld [vmem:[#allocation2 + $0x140] sm:$0xff]  ;;  %v585_v4 = vld [vmem:[#allocation2 + $0x170] sm:$0xff] }
  0x5f   : > { %1388 = vmatpush1.bf16.msra.mxu0 %v1387_v62  ;;  %1368 = vmatpush1.bf16.msra.mxu1 %v1367_v21  ;;  %v573_v62 = vld [vmem:[#allocation2 + $0x110] sm:$0xff]  ;;  %v592_v5 = vld [vmem:[#allocation2 + $0x1a8] sm:$0xff]  ;;  %v598_v6 = vld [vmem:[#allocation2 + $0x1d8] sm:$0xff]  ;;  %v1419_v7 = vpack.c.bf16 %v585_v4, %v579_v3 }
  0x60   : > { %1390 = vmatprep.subr.bf16.mxu0 %v1389_v2  ;;  %1370 = vmatprep.subr.bf16.mxu1 %v1369_v28  ;;  %v1415_v1 = vpack.c.bf16 %v573_v62, %v567_v61  ;;  %v1417_v2 = vpack.c.bf16 %v586_v0, %v580_v63  ;;  %v1421_v8 = vpack.c.bf16 %v598_v6, %v592_v5  ;;  %v591_v9 = vld [vmem:[#allocation2 + $0x1a0] sm:$0xff]  ;;  %v604_v11 = vld [vmem:[#allocation2 + $0x208] sm:$0xff]  ;;  %v610_v12 = vld [vmem:[#allocation2 + $0x238] sm:$0xff]  ;;  %v659_v61 = vsub.s32 5, %v638_v31 }
  0x61   : > { %v1425_v14 = vpack.c.bf16 %v610_v12, %v604_v11  ;;  %v603_v15 = vld [vmem:[#allocation2 + $0x200] sm:$0xff]  ;;  %v609_v16 = vld [vmem:[#allocation2 + $0x230] sm:$0xff]  ;;  %v616_v17 = vld [vmem:[#allocation2 + $0x268] sm:$0xff] }
  0x62   : > { %v622_v18 = vld [vmem:[#allocation2 + $0x298] sm:$0xff]  ;;  %v1427_v19 = vpack.c.bf16 %v609_v16, %v603_v15  ;;  %v615_v21 = vld [vmem:[#allocation2 + $0x260] sm:$0xff]  ;;  %v628_v23 = vld [vmem:[#allocation2 + $0x2c8] sm:$0xff] }
  0x63   : > { %1392 = vmatpush1.bf16.msra.mxu0 %v1391_v10  ;;  %1372 = vmatpush1.bf16.msra.mxu1 %v1371_v32  ;;  %v597_v10 = vld [vmem:[#allocation2 + $0x1d0] sm:$0xff]  ;;  %v634_v24 = vld [vmem:[#allocation2 + $0x2f8] sm:$0xff]  ;;  %v627_v27 = vld [vmem:[#allocation2 + $0x2c0] sm:$0xff]  ;;  %v639_v32 = vsub.s32 0, %v638_v31 }
  0x64   : > { %1394 = vmatprep.subr.bf16.mxu0 %v1393_v13  ;;  %1406 = vmatprep.subr.bf16.mxu1 %v1405_v40  ;;  %v1423_v13 = vpack.c.bf16 %v597_v10, %v591_v9  ;;  %v1433_v26 = vpack.c.bf16 %v634_v24, %v628_v23  ;;  %v633_v28 = vld [vmem:[#allocation2 + $0x2f0] sm:$0xff]  ;;  %v635_v34 = vld [vmem:[%s2243_s5] sm:$0x3f]  ;;  %v1753_v10 = vmov 0  }
  0x65   : > { %v1435_v29 = vpack.c.bf16 %v633_v28, %v627_v27  ;;  %v648_v38 = vrot.slane %v635_v34, %v647_v33  ;;  %v652_v40 = vrot.slane %v635_v34, %v651_v36  ;;  %v660_v0 = vrot.slane %v635_v34, %v659_v61  ;;  %1515 = vset.pattern.permute.xlu0 %v1753_v10 }
  0x66   : > { %1516 = vset.pattern.permute.xlu1 %v1753_v10 }
  0x67   : > { %1396 = vmatpush1.bf16.msra.mxu0 %v1395_v20  ;;  %v1429_v20 = vpack.c.bf16 %v622_v18, %v616_v17 }
  0x68   : > { %1398 = vmatprep.subr.bf16.mxu0 %v1397_v22  ;;  %v621_v22 = vld [vmem:[#allocation2 + $0x290] sm:$0xff] }
  0x6b   : > { %1400 = vmatpush1.bf16.msra.mxu0 %v1399_v25  ;;  %v1431_v25 = vpack.c.bf16 %v621_v22, %v615_v21 }
  0x6c   : > { %1402 = vmatprep.subr.bf16.mxu0 %v1401_v35  ;;  %v643_v35 = vsub.s32 1, %v638_v31 }
  0x6e   : > { %v644_v39 = vrot.slane %v635_v34, %v643_v35 }
  0x6f   : > { %1404 = vmatpush1.bf16.msra.mxu0 %v1403_v37  ;;  %v640_v37 = vrot.slane %v635_v34, %v639_v32 }
 0x125   : > { %v1336_v43 = vpop.f32.mrb[0].mxu0 }
 0x126   : > { %v532_v46 = vadd.f32 %v1336_v43, %v1289_v42  ;;  %v526_v47 = vpop.f32.mrb[1].mxu0 }
 0x127   : > { %v527_v50 = vadd.f32 %v1289_v42, %v526_v47 }
 0x128   : > { %v1934_v51 = vmax.f32 %v532_v46, 0.0 }
 0x129   : > { %v1936_v53 = vmax.f32 %v527_v50, 0.0 }
 0x12a   : > { %538 = vst [vmem:[%s1938_s26 + $0x8] sm:$0xff] %v1934_v51 }
 0x12b   : > { %537 = vst [vmem:[%s1938_s26] sm:$0xff] %v1936_v53  ;;  %732 = vmatmul.mubr.f32.vlgmr.msra.gmra.mrb[0].mxu1 %v1936_v53  ;;  %809 = vmatmul.mubr.f32.vlgmr.msra.gmra.mrb[2].mxu0 %v1936_v53 }
 0x12c   : > { %1408 = vmatpush1.bf16.msra.mxu1 %v1407_v52  ;;  %737 = vmatprep.mubr.f32.mxu1 %v1752_v41 }
 0x12d   : > { %814 = vmatprep.mubr.f32.mxu0 %v1752_v41  ;;  %1410 = vmatprep.subr.bf16.mxu1 %v1409_v54 }
 0x12f   : > { %738 = vmatmul.mubr.f32.gmra.mrb[2].mxu1 %v1934_v51  ;;  %815 = vmatmul.mubr.f32.gmra.mrb[4].mxu0 %v1934_v51 }
 0x130   : > { %1412 = vmatpush1.bf16.msra.mxu1 %v1411_v59  ;;  %885 = vmatprep.mubr.f32.mxu1 %v1752_v41  ;;  %v940_v59 = vld [vmem:[%s1972_s21] sm:$0xff] }
 0x131   : > { %1414 = vmatprep.subr.bf16.mxu1 %v1413_v60  ;;  %v655_v60 = vsub.s32 4, %v638_v31  ;;  %v942_v62 = vmul.f32 1.442695, %v940_v59 }
 0x133   : > { %v656_v63 = vrot.slane %v635_v34, %v655_v60  ;;  %1517 = vpow2.f32 %v942_v62 }
 0x134   : > { %1416 = vmatpush1.bf16.msra.mxu1 %v1415_v1 }
 0x135   : > { %1418 = vmatprep.subr.bf16.mxu1 %v1417_v2 }
 0x138   : > { %1420 = vmatpush1.bf16.msra.mxu1 %v1419_v7 }
 0x139   : > { %1422 = vmatprep.subr.bf16.mxu1 %v1421_v8 }
 0x13c   : > { %1424 = vmatpush1.bf16.msra.mxu1 %v1423_v13 }
 0x13d   : > { %1426 = vmatprep.subr.bf16.mxu1 %v1425_v14  ;;  %v1518_v9 = vpop.eup %1517 }
 0x140   : > { %1428 = vmatpush1.bf16.msra.mxu1 %v1427_v19 }
 0x141   : > { %1430 = vmatprep.subr.bf16.mxu1 %v1429_v20 }
 0x144   : > { %1432 = vmatpush1.bf16.msra.mxu1 %v1431_v25 }
 0x145   : > { %1434 = vmatprep.subr.bf16.mxu1 %v1433_v26  ;;  %v941_v26 = vld [vmem:[%s1972_s21 + $0x8] sm:$0xff] }
 0x146   : > { %v944_v28 = vmul.f32 1.442695, %v941_v26 }
 0x148   : > { %1436 = vmatpush1.bf16.msra.mxu1 %v1435_v29 }
 0x14b   : > { %886 = vmatmul.mubr.f32.vlgmr.msra.gmra.mrb[4].mxu1 %v1936_v53 }
 0x14c   : > { %891 = vmatprep.mubr.f32.mxu1 %v1752_v41 }
 0x14f   : > { %892 = vmatmul.mubr.f32.gmra.mrb[6].mxu1 %v1934_v51 }
 0x1fe   : > { %v733_v41 = vpop.f32.mrb[0].mxu1  ;;  %v810_v42 = vpop.f32.mrb[2].mxu0 }
 0x1ff   : > { %v734_v43 = vadd.f32 %v733_v41, %v640_v37  ;;  %v811_v44 = vadd.f32 %v810_v42, %v648_v38  ;;  %v735_v45 = vpop.f32.mrb[1].mxu1  ;;  %v812_v46 = vpop.f32.mrb[3].mxu0 }
 0x200   : > { %v736_v47 = vadd.f32 %v735_v45, %v644_v39  ;;  %v813_v48 = vadd.f32 %v812_v46, %v652_v40 }
 0x201   : > { %932 = vst [vmem:[%s1961_s20] sm:$0xff] %v811_v44 }
 0x202   : > { %933 = vst [vmem:[%s1961_s20 + $0x8] sm:$0xff] %v813_v48  ;;  %v739_v49 = vpop.f32.mrb[2].mxu1  ;;  %v816_v50 = vpop.f32.mrb[4].mxu0  ;;  %v898_v51 = vmax.f32 %v734_v43, %v736_v47 }
 0x203   : > { %v740_v52 = vadd.f32 %v739_v49, %v640_v37  ;;  %v817_v53 = vadd.f32 %v816_v50, %v648_v38  ;;  %v741_v54 = vpop.f32.mrb[3].mxu1  ;;  %v818_v55 = vpop.f32.mrb[5].mxu0 }
 0x204   : > { %v742_v56 = vadd.f32 %v741_v54, %v644_v39  ;;  %v819_v57 = vadd.f32 %v818_v55, %v652_v40  ;;  %899 = vmax.xlane.f32.xlu0 %v898_v51 }
 0x205   : > { %934 = vst [vmem:[%s1961_s20 + $0x10] sm:$0xff] %v817_v53 }
 0x206   : > { %935 = vst [vmem:[%s1961_s20 + $0x18] sm:$0xff] %v819_v57  ;;  %v901_v58 = vmax.f32 %v740_v52, %v742_v56  ;;  %s2014_s20 = scalar_lea.sflag [#allocation7], %s2223_s27 }
 0x208   : > { %902 = vmax.xlane.f32.xlu0 %v901_v58 }
 0x21e   : > { %v887_v1 = vpop.f32.mrb[4].mxu1  ;;  %948 = vperm.xlu0 %1515, %v1518_v9  }
 0x21f   : > { %v888_v2 = vadd.f32 %v887_v1, %v656_v63  ;;  %v889_v3 = vpop.f32.mrb[5].mxu1 }
 0x220   : > { %v890_v4 = vadd.f32 %v889_v3, %v660_v0 }
 0x221   : > { %936 = vst [vmem:[%s1976_s29] sm:$0xff] %v888_v2 }
 0x222   : > { %937 = vst [vmem:[%s1976_s29 + $0x8] sm:$0xff] %v890_v4  ;;  %v893_v5 = vpop.f32.mrb[6].mxu1 }
 0x223   : > { %v894_v6 = vadd.f32 %v893_v5, %v656_v63  ;;  %v895_v7 = vpop.f32.mrb[7].mxu1 }
 0x224   : > { %v896_v8 = vadd.f32 %v895_v7, %v660_v0 }
 0x225   : > { %938 = vst [vmem:[%s1976_s29 + $0x10] sm:$0xff] %v894_v6 }
 0x226   : > { %939 = vst [vmem:[%s1976_s29 + $0x18] sm:$0xff] %v896_v8  ;;  %s1561_s29 = scalar_lea.vmem %s1998_s18, 512 }
 0x227   : > { %p1562_p6 = scmp.ne.s32.totalorder %s1998_s18, %s1561_s29  ;;  %p1569_p3 = scmp.lt.s32.totalorder %s1567_s3, %s1561_s29 }
 0x229   : > { %p1563_p10 = pnand %p1562_p6, %p2246_p9  ;;  %p1570_p4 = por %p1569_p3, %p1568_p2 }
 0x22b   : > { %p1564_p12 = pneg %p1563_p10 }
 0x22d   : > { %p1571_p7 = pnand %p1570_p4, %p1564_p12 }
 0x291   : > { %v900_v11 = vpop.xlane.xlu0 %899 }
 0x292   : > { %v904_v12 = vsub.f32 %v734_v43, %v900_v11  ;;  %v905_v13 = vsub.f32 %v736_v47, %v900_v11 }
 0x294   : > { %v908_v14 = vmul.f32 1.442695, %v904_v12  ;;  %v910_v15 = vmul.f32 1.442695, %v905_v13 }
 0x295   : > { %v903_v16 = vpop.xlane.xlu0 %902 }
 0x296   : > { %1519 = vpow2.f32 %v908_v14  ;;  %v906_v17 = vsub.f32 %v740_v52, %v903_v16  ;;  %v907_v18 = vsub.f32 %v742_v56, %v903_v16 }
 0x297   : > { %1521 = vpow2.f32 %v910_v15 }
 0x298   : > { %v912_v19 = vmul.f32 1.442695, %v906_v17  ;;  %v914_v20 = vmul.f32 1.442695, %v907_v18 }
 0x29a   : > { %1523 = vpow2.f32 %v912_v19 }
 0x29b   : > { %1525 = vpow2.f32 %v914_v20 }
 0x29c   : > { %1527 = vpow2.f32 %v944_v28 }
 0x2a0   : > { %v1982_v21 = vpop.eup %1519 }
 0x2a1   : > { %v1984_v22 = vpop.eup %1521 }
 0x2a2   : > { %v916_v23 = vadd.f32 %v1984_v22, %v1982_v21 }
 0x2a4   : > { %v1988_v24 = vpop.eup %1523  ;;  %917 = vadd.xlane.f32.xlu1 %v916_v23 }
 0x2a5   : > { %v1990_v25 = vpop.eup %1525 }
 0x2a6   : > { %v919_v27 = vadd.f32 %v1990_v25, %v1988_v24  ;;  %v1528_v29 = vpop.eup %1527 }
 0x2a8   : > { %920 = vadd.xlane.f32.xlu1 %v919_v27 }
 0x2b9   : > { %953 = vperm.xlu1 %1516, %v1528_v29  }
 0x2ba   : > { %1574 = shalt.err (!%p1571_p7)
}
 0x2bb   : > { %s1575_s0 = scalar_lea.hbm %s2010_s1, 512  ;;  %s1579_s30 = scalar_lea.hbm %s2245_s7, 1024 }
 0x2bc   : > { %p1576_p8 = scmp.ne.s32.totalorder %s2010_s1, %s1575_s0  ;;  %p1580_p1 = scmp.lt.u32.totalorder %s2010_s1, %s2245_s7 }
 0x2bd   : > { %p1581_p0 = scmp.lt.u32.totalorder %s1579_s30, %s1575_s0  ;;  %p1583_p6 = scmp.lt.u32.totalorder %s1575_s0, %s2010_s1 }
 0x2be   : > { %p1577_p11 = pnand %p1576_p8, %p2246_p9 }
 0x2bf   : > { %p1582_p5 = por %p1581_p0, %p1580_p1 }
 0x2c0   : > { %p1578_p13 = pneg %p1577_p11 }
 0x2c1   : > { %p1584_p10 = por %p1583_p6, %p1582_p5 }
 0x2c3   : > { %p1585_p12 = pnand %p1584_p10, %p1578_p13 }
 0x2c5   : > { %1588 = shalt.err (!%p1585_p12)
}
 0x2c6   : > { %s1755_s3 = smov 256   ;;  %s1756_s27 = smov 16  }
 0x2c7   : > { %1442 = dma.vmem_to_hbm [thread:$0]  (%p2246_p9), %s1998_s18, 512, %s2010_s1, %s2014_s20, %s1755_s3, %s1755_s3, %s1756_s27  }
 0x2c8   : > { %s2045_s0 = scalar_lea.hbm %s2217_s9, %s2004_s25  ;;  %s2247_s21 = sand.u32 1, %s1839_s17  }
 0x2c9   : > { %s2049_s30 = scalar_lea.sflag [#allocation10], %s2247_s21  ;;  %s1589_s2 = scalar_lea.vmem %s2000_s28, 512 }
 0x2ca   : > { %p1590_p2 = scmp.ne.s32.totalorder %s2000_s28, %s1589_s2  ;;  %s1757_s5 = smov [#allocation9]  }
 0x2cb   : > { %s1593_s7 = sshll.u32 %s1757_s5, 4  ;;  %s1594_s7 = int_to_ptr.vmem [resolvable:$false] %s1593_s7 }
 0x2cc   : > { %p1591_p3 = pnand %p1590_p2, %p2246_p9  ;;  %s1595_s22 = scalar_lea.vmem %s1594_s7, 1024 }
 0x2cd   : > { %p1596_p7 = scmp.lt.s32.totalorder %s2000_s28, %s1594_s7  ;;  %p1597_p8 = scmp.lt.s32.totalorder %s1595_s22, %s1589_s2 }
 0x2ce   : > { %p1592_p4 = pneg %p1591_p3 }
 0x2cf   : > { %p1598_p11 = por %p1597_p8, %p1596_p7 }
 0x2d1   : > { %p1599_p13 = pnand %p1598_p11, %p1592_p4 }
 0x2d3   : > { %1602 = shalt.err (!%p1599_p13)
}
 0x2d4   : > { %s1603_s1 = scalar_lea.hbm %s2045_s0, 512  ;;  %s1607_s5 = scalar_lea.hbm %s2217_s9, 1024 }
 0x2d5   : > { %p1604_p1 = scmp.ne.s32.totalorder %s2045_s0, %s1603_s1  ;;  %p1608_p6 = scmp.lt.u32.totalorder %s2045_s0, %s2217_s9 }
 0x2d6   : > { %p1609_p10 = scmp.lt.u32.totalorder %s1607_s5, %s1603_s1  ;;  %p1611_p2 = scmp.lt.u32.totalorder %s1603_s1, %s2045_s0 }
 0x2d7   : > { %p1605_p0 = pnand %p1604_p1, %p2246_p9 }
 0x2d8   : > { %p1610_p12 = por %p1609_p10, %p1608_p6 }
 0x2d9   : > { %p1606_p5 = pneg %p1605_p0 }
 0x2da   : > { %p1612_p3 = por %p1611_p2, %p1610_p12 }
 0x2dc   : > { %p1613_p4 = pnand %p1612_p3, %p1606_p5 }
 0x2de   : > { %1616 = shalt.err (!%p1613_p4)
}
 0x2df   : > { %1444 = dma.vmem_to_hbm [thread:$0]  (%p2246_p9), %s2000_s28, 512, %s2045_s0, %s2049_s30, %s1755_s3, %s1755_s3, %s1756_s27  }
 0x2e0   : > { %s2248_s22 = sshll.u32 %s1938_s26, 4  ;;  %s1322_s21 = sshll.u32 %s1839_s17, 8  ;;  %s2078_s22 = int_to_ptr.vmem [resolvable:$true] %s2248_s22 }
 0x2e1   : > { %s2084_s18 = scalar_lea.hbm %s2218_s10, %s1322_s21  ;;  %s1617_s4 = scalar_lea.vmem %s2078_s22, 256 }
 0x2e2   : > { %p1618_p7 = scmp.ne.s32.totalorder %s2078_s22, %s1617_s4  ;;  %s1758_s5 = smov [#allocation11]  }
 0x2e3   : > { %s1621_s29 = sshll.u32 %s1758_s5, 4  ;;  %s1622_s29 = int_to_ptr.vmem [resolvable:$false] %s1621_s29 }
 0x2e4   : > { %p1619_p8 = pnand %p1618_p7, %p2246_p9  ;;  %s1623_s26 = scalar_lea.vmem %s1622_s29, 512 }
 0x2e5   : > { %p1624_p13 = scmp.lt.s32.totalorder %s2078_s22, %s1622_s29  ;;  %p1625_p1 = scmp.lt.s32.totalorder %s1623_s26, %s1617_s4 }
 0x2e6   : > { %p1620_p11 = pneg %p1619_p8 }
 0x2e7   : > { %p1626_p0 = por %p1625_p1, %p1624_p13 }
 0x2e9   : > { %p1627_p5 = pnand %p1626_p0, %p1620_p11 }
 0x2eb   : > { %1630 = shalt.err (!%p1627_p5)
}
 0x2ec   : > { %s1631_s17 = scalar_lea.hbm %s2084_s18, 256  ;;  %s1635_s7 = scalar_lea.hbm %s2218_s10, 512 }
 0x2ed   : > { %p1632_p6 = scmp.ne.s32.totalorder %s2084_s18, %s1631_s17  ;;  %p1636_p2 = scmp.lt.u32.totalorder %s2084_s18, %s2218_s10 }
 0x2ee   : > { %p1637_p3 = scmp.lt.u32.totalorder %s1635_s7, %s1631_s17  ;;  %p1639_p7 = scmp.lt.u32.totalorder %s1631_s17, %s2084_s18 }
 0x2ef   : > { %p1633_p10 = pnand %p1632_p6, %p2246_p9 }
 0x2f0   : > { %p1638_p4 = por %p1637_p3, %p1636_p2 }
 0x2f1   : > { %p1634_p12 = pneg %p1633_p10 }
 0x2f2   : > { %p1640_p8 = por %p1639_p7, %p1638_p4 }
 0x2f4   : > { %p1641_p11 = pnand %p1640_p8, %p1634_p12 }
 0x2f6   : > { %1644 = shalt.err (!%p1641_p11)
}
 0x2f7   : > { %s1759_s1 = smov 128   ;;  %s1760_s4 = smov 8   ;;  %v949_v33 = vpop.permute.xlu0 %948 }
 0x2f8   : > { %1445 = dma.vmem_to_hbm [thread:$0]  (%p2246_p9), %s2078_s22, 256, %s2084_s18, %s2049_s30, %s1759_s1, %s1759_s1, %s1760_s4  }
 0x2f9   : > { %s391_s5 = scalar_lea.vmem [#allocation5], %s1958_s12  ;;  %s2112_s30 = scalar_lea.vmem [#allocation8], %s1958_s12 }
 0x2fa   : > { %s999_s29 = sshll.u32 %s391_s5, 4  ;;  %s1033_s22 = sshll.u32 %s2112_s30, 4  ;;  %s2115_s29 = int_to_ptr.vmem [resolvable:$true] %s999_s29  ;;  %s2127_s22 = int_to_ptr.vmem [resolvable:$true] %s1033_s22 }
 0x2fb   : > { %s2125_s12 = scalar_lea.hbm %s2214_s6, %s2004_s25  ;;  %s2133_s0 = scalar_lea.hbm %s2216_s8, %s2004_s25 }
 0x2fc   : > { %s965_s7 = scalar_lea.sflag [#allocation4], %s1928_s11  ;;  %s1645_s21 = scalar_lea.vmem %s2115_s29, 512 }
 0x2fd   : > { %p1646_p13 = scmp.ne.s32.totalorder %s2115_s29, %s1645_s21  ;;  %s1761_s2 = smov [#allocation5]  }
 0x2fe   : > { %s1649_s1 = sshll.u32 %s1761_s2, 4  ;;  %s1650_s1 = int_to_ptr.vmem [resolvable:$false] %s1649_s1 }
 0x2ff   : > { %p1647_p1 = pnand %p1646_p13, %p2246_p9  ;;  %s1651_s4 = scalar_lea.vmem %s1650_s1, 1024 }
 0x300   : > { %p1652_p5 = scmp.lt.s32.totalorder %s2115_s29, %s1650_s1  ;;  %p1653_p6 = scmp.lt.s32.totalorder %s1651_s4, %s1645_s21 }
 0x301   : > { %p1648_p0 = pneg %p1647_p1 }
 0x302   : > { %p1654_p10 = por %p1653_p6, %p1652_p5 }
 0x304   : > { %p1655_p12 = pnand %p1654_p10, %p1648_p0 }
 0x331   : > { %v918_v30 = vpop.xlane.xlu1 %917 }
 0x332   : > { %1529 = vrcp.f32 %v918_v30 }
 0x335   : > { %v921_v31 = vpop.xlane.xlu1 %920 }
 0x336   : > { %1531 = vrcp.f32 %v921_v31 }
 0x339   : > { %v954_v39 = vpop.permute.xlu1 %953 }
 0x33c   : > { %v1530_v32 = vpop.eup %1529 }
 0x33d   : > { %v924_v34 = vmul.f32 %v1530_v32, %v1982_v21  ;;  %v925_v35 = vmul.f32 %v1530_v32, %v1984_v22 }
 0x33f   : > { %928 = vst [vmem:[%s391_s5] sm:$0xff] %v924_v34  ;;  %929 = vst [vmem:[%s391_s5 + $0x8] sm:$0xff] %v925_v35  ;;  %v956_v36 = vmul.f32 %v949_v33, %v924_v34  ;;  %v957_v37 = vmul.f32 %v949_v33, %v925_v35 }
 0x340   : > { %v1532_v38 = vpop.eup %1531 }
 0x341   : > { %960 = vst [vmem:[%s2112_s30] sm:$0xff] %v956_v36  ;;  %961 = vst [vmem:[%s2112_s30 + $0x8] sm:$0xff] %v957_v37  ;;  %v926_v40 = vmul.f32 %v1532_v38, %v1988_v24  ;;  %v927_v41 = vmul.f32 %v1532_v38, %v1990_v25 }
 0x343   : > { %930 = vst [vmem:[%s391_s5 + $0x10] sm:$0xff] %v926_v40  ;;  %931 = vst [vmem:[%s391_s5 + $0x18] sm:$0xff] %v927_v41  ;;  %v958_v42 = vmul.f32 %v954_v39, %v926_v40  ;;  %v959_v43 = vmul.f32 %v954_v39, %v927_v41 }
 0x344   : > { %1658 = shalt.err (!%p1655_p12)
}
 0x345   : > { %s1659_s25 = scalar_lea.hbm %s2125_s12, 512  ;;  %s1663_s26 = scalar_lea.hbm %s2214_s6, 1024 }
 0x346   : > { %p1660_p2 = scmp.ne.s32.totalorder %s2125_s12, %s1659_s25  ;;  %p1664_p7 = scmp.lt.u32.totalorder %s2125_s12, %s2214_s6 }
 0x347   : > { %p1665_p8 = scmp.lt.u32.totalorder %s1663_s26, %s1659_s25  ;;  %p1667_p13 = scmp.lt.u32.totalorder %s1659_s25, %s2125_s12 }
 0x348   : > { %p1661_p3 = pnand %p1660_p2, %p2246_p9 }
 0x349   : > { %p1666_p11 = por %p1665_p8, %p1664_p7 }
 0x34a   : > { %p1662_p4 = pneg %p1661_p3 }
 0x34b   : > { %p1668_p1 = por %p1667_p13, %p1666_p11 }
 0x34d   : > { %p1669_p0 = pnand %p1668_p1, %p1662_p4 }
 0x34f   : > { %1672 = shalt.err (!%p1669_p0)
}
 0x350   : > { %1441 = dma.vmem_to_hbm [thread:$0]  (%p2246_p9), %s2115_s29, 512, %s2125_s12, %s965_s7, %s1755_s3, %s1755_s3, %s1756_s27  }
 0x351   : > { %962 = vst [vmem:[%s2112_s30 + $0x10] sm:$0xff] %v958_v42  ;;  %963 = vst [vmem:[%s2112_s30 + $0x18] sm:$0xff] %v959_v43  ;;  %s1673_s21 = scalar_lea.vmem %s2127_s22, 512  ;;  %s1762_s2 = smov [#allocation8]  }
 0x352   : > { %p1674_p5 = scmp.ne.s32.totalorder %s2127_s22, %s1673_s21  ;;  %s1677_s1 = sshll.u32 %s1762_s2, 4  ;;  %s1678_s1 = int_to_ptr.vmem [resolvable:$false] %s1677_s1 }
 0x353   : > { %s1679_s11 = scalar_lea.vmem %s1678_s1, 1024  ;;  %p1680_p12 = scmp.lt.s32.totalorder %s2127_s22, %s1678_s1 }
 0x354   : > { %p1675_p6 = pnand %p1674_p5, %p2246_p9  ;;  %p1681_p2 = scmp.lt.s32.totalorder %s1679_s11, %s1673_s21 }
 0x356   : > { %p1676_p10 = pneg %p1675_p6  ;;  %p1682_p3 = por %p1681_p2, %p1680_p12 }
 0x358   : > { %p1683_p4 = pnand %p1682_p3, %p1676_p10 }
 0x35a   : > { %1686 = shalt.err (!%p1683_p4)
}
 0x35b   : > { %s1687_s29 = scalar_lea.hbm %s2133_s0, 512  ;;  %s1691_s7 = scalar_lea.hbm %s2216_s8, 1024 }
 0x35c   : > { %p1688_p7 = scmp.ne.s32.totalorder %s2133_s0, %s1687_s29  ;;  %p1692_p13 = scmp.lt.u32.totalorder %s2133_s0, %s2216_s8 }
 0x35d   : > { %p1693_p1 = scmp.lt.u32.totalorder %s1691_s7, %s1687_s29  ;;  %p1695_p5 = scmp.lt.u32.totalorder %s1687_s29, %s2133_s0 }
 0x35e   : > { %p1689_p8 = pnand %p1688_p7, %p2246_p9 }
 0x35f   : > { %p1694_p0 = por %p1693_p1, %p1692_p13 }
 0x360   : > { %p1690_p11 = pneg %p1689_p8 }
 0x361   : > { %p1696_p6 = por %p1695_p5, %p1694_p0 }
 0x363   : > { %p1697_p10 = pnand %p1696_p6, %p1690_p11 }
 0x365   : > { %1700 = shalt.err (!%p1697_p10)
}
 0x366   : > { %1443 = dma.vmem_to_hbm [thread:$0]  (%p2246_p9), %s2127_s22, 512, %s2133_s0, %s2014_s20, %s1755_s3, %s1755_s3, %s1756_s27  }
 0x367 PF: > { %p1473_p12 = scmp.ge.s32.totalorder %s1747_s16, 2  ;;  %s1081_s5 = sand.u32 1, %s1735_s13  }
 0x368   : > { %p2249_p2 = scmp.ne.s32.totalorder %s2233_s24, 0  ;;  %s1082_s18 = scalar_lea.sflag [#allocation4], %s1081_s5 }
 0x36a   : > { %p1456_p3 = pnand %p1473_p12, %p2249_p2 }
 0x36c   : > { %1722 = dma.done.wait (!%p1456_p3), %s1082_s18, 512  }
 0x36d   : > { %1724 = vsyncadd (!%p1456_p3), %s1082_s18, 4294966784  ;;  %s2250_s23 = sadd.s32 4294967294, %s1747_s16  }
 0x36e   : > { %s1090_s26 = sand.u32 1, %s2250_s23  }
 0x36f   : > { %s1091_s17 = scalar_lea.sflag [#allocation7], %s1090_s26 }
 0x370   : > { %1726 = dma.done.wait (!%p1456_p3), %s1091_s17, 1024  }
 0x371   : > { %1728 = vsyncadd (!%p1456_p3), %s1091_s17, 4294966272  ;;  %s1109_s28 = scalar_lea.sflag [#allocation10], %s1090_s26 }
 0x372   : > { %1730 = dma.done.wait (!%p1456_p3), %s1109_s28, 768  }
 0x373   : > { %1732 = vsyncadd (!%p1456_p3), %s1109_s28, 4294966528  ;;  %s2251_s20 = sld [smem:[#allocation16_spill]]  ;;  %p28_p9 = scmp.ge.s32.totalorder %s1843_s19, 4  }
 0x374   : > { %s2252_s13 = smov %s1739_s14  ;;  %s2253_s14 = smov %s1743_s15 }
 0x375   : > { %s2255_s16 = smov %s1843_s19  ;;  %30 = sbr.rel (!%p28_p9) target bundleno = 16 (0x10), region = 151 }
 0x379   : > { %s2254_s15 = smov %s2251_s20 }
 0x37c   :  { %1123 = vsyncpa [#allocation3], 1 }
 0x37d   :  { %1125 = vsyncpa [#allocation3 + $0x1], 1 }
 0x37e   :  { %1126 = vsyncpa [#allocation4], 1 }
 0x37f   :  { %1128 = vsyncpa [#allocation4 + $0x1], 1 }
 0x380   :  { %1129 = vsyncpa [#allocation7], 1 }
 0x381   :  { %1131 = vsyncpa [#allocation7 + $0x1], 1 }
 0x382   :  { %1132 = vsyncpa [#allocation10], 1 }
 0x383   :  { %1134 = vsyncpa [#allocation10 + $0x1], 1 }

</bundles_post_ra>
